<compile_context>
chip_gen: v7x
topology: tpu7x:2x2x1
jax: 0.10.0
libtpu: 0.0.40
codegen_flags: <defaults>
</compile_context>

<pallas_src>
import functools

import jax
import jax.numpy as jnp
from jax import lax
from jax.experimental import pallas as pl
from jax.experimental.pallas import tpu as pltpu

_P_DROP = 0.25
_KEEP_SCALE = 1.0 / (1.0 - _P_DROP)   # 1/0.75


def _round_up(a, m):
    return (a + m - 1) // m * m


def _linear_bias_store(x, w_ref, b_ref, o_ref):
    # y = x @ W^T + b with W kept in PyTorch [D_out, D_in] layout:
    # contract x dim 1 against w dim 1 directly on the MXU (no transpose HLO).
    acc = lax.dot_general(
        x, w_ref[...],
        dimension_numbers=(((1,), (1,)), ((), ())),
        preferred_element_type=jnp.float32,
    )
    o_ref[...] = (acc + b_ref[...].astype(jnp.float32)).astype(o_ref.dtype)


def _kernel_eval(x_ref, w_ref, b_ref, o_ref):
    _linear_bias_store(x_ref[...], w_ref, b_ref, o_ref)


def _kernel_train_hwprng(seed_ref, x_ref, w_ref, b_ref, o_ref):
    # Per-tile seed -> independent dropout masks across batch tiles.
    pltpu.prng_seed(seed_ref[0] + pl.program_id(0))
    bits = pltpu.prng_random_bits(x_ref.shape)
    keep = (bits & 3) != 0                      # P(keep) = 3/4, one integer compare
    x = jnp.where(keep, x_ref[...] * _KEEP_SCALE, 0.0).astype(x_ref.dtype)
    _linear_bias_store(x, w_ref, b_ref, o_ref)


def _kernel_train_bits(x_ref, bits_ref, w_ref, b_ref, o_ref):
    keep = (bits_ref[...] & jnp.uint32(3)) != 0  # P(keep) = 3/4
    x = jnp.where(keep, x_ref[...] * _KEEP_SCALE, 0.0).astype(x_ref.dtype)
    _linear_bias_store(x, w_ref, b_ref, o_ref)


def thumbnail_net(x, weight, bias, seed=0, *, training=True,
                  use_hw_prng=None, batch_tile=512):
    """x: [B, D_in]; weight: [D_out, D_in] (PyTorch layout); bias: [D_out]."""
    B, d_in = x.shape
    d_out, d_in_w = weight.shape
    assert d_in_w == d_in, "weight must be [D_out, D_in]"
    if use_hw_prng is None:
        use_hw_prng = jax.default_backend() == "tpu"

    # Batch tiling: tiles are multiples of 8 sublanes, up to `batch_tile` rows.
    tb = min(batch_tile, _round_up(B, 8))
    Bp = _round_up(B, tb)
    if Bp != B:
        x = jnp.pad(x, ((0, Bp - B), (0, 0)))
    grid = (Bp // tb,)

    b2 = bias.reshape(1, d_out).astype(jnp.float32)
    out_shape = jax.ShapeDtypeStruct((Bp, d_out), x.dtype)

    bytes_accessed = (Bp * d_in * x.dtype.itemsize
                      + d_out * d_in * weight.dtype.itemsize
                      + d_out * 4
                      + Bp * d_out * x.dtype.itemsize)
    cost = pl.CostEstimate(flops=2 * Bp * d_in * d_out,
                           transcendentals=0,
                           bytes_accessed=bytes_accessed)
    cparams = pltpu.CompilerParams(dimension_semantics=("parallel",))

    if not training:
        out = pl.pallas_call(
            _kernel_eval,
            out_shape=out_shape,
            grid_spec=pltpu.PrefetchScalarGridSpec(
                num_scalar_prefetch=0,
                grid=grid,
                in_specs=[
                    pl.BlockSpec((tb, d_in), lambda i: (i, 0)),
                    pl.BlockSpec((d_out, d_in), lambda i: (0, 0)),  # VMEM-resident
                    pl.BlockSpec((1, d_out), lambda i: (0, 0)),
                ],
                out_specs=pl.BlockSpec((tb, d_out), lambda i: (i, 0)),
            ),
            compiler_params=cparams,
            cost_estimate=cost,
        )(x, weight, b2)
    elif use_hw_prng:
        # TPU path: dropout bits from the in-kernel hardware PRNG (no bits DMA).
        seed_arr = jnp.asarray([seed], dtype=jnp.int32)
        out = pl.pallas_call(
            _kernel_train_hwprng,
            out_shape=out_shape,
            grid_spec=pltpu.PrefetchScalarGridSpec(
                num_scalar_prefetch=1,                   # seed lands in SMEM
                grid=grid,
                in_specs=[
                    pl.BlockSpec((tb, d_in), lambda i, s: (i, 0)),
                    pl.BlockSpec((d_out, d_in), lambda i, s: (0, 0)),
                    pl.BlockSpec((1, d_out), lambda i, s: (0, 0)),
                ],
                out_specs=pl.BlockSpec((tb, d_out), lambda i, s: (i, 0)),
            ),
            compiler_params=cparams,
            cost_estimate=cost,
        )(seed_arr, x, weight, b2)
    else:
        # Portable path (non-TPU backends / interpret): stream uint32 bits in.
        bits = jax.random.bits(jax.random.PRNGKey(seed), (Bp, d_in),
                               dtype=jnp.uint32)
        out = pl.pallas_call(
            _kernel_train_bits,
            out_shape=out_shape,
            grid_spec=pltpu.PrefetchScalarGridSpec(
                num_scalar_prefetch=0,
                grid=grid,
                in_specs=[
                    pl.BlockSpec((tb, d_in), lambda i: (i, 0)),
                    pl.BlockSpec((tb, d_in), lambda i: (i, 0)),
                    pl.BlockSpec((d_out, d_in), lambda i: (0, 0)),
                    pl.BlockSpec((1, d_out), lambda i: (0, 0)),
                ],
                out_specs=pl.BlockSpec((tb, d_out), lambda i: (i, 0)),
            ),
            compiler_params=cparams,
            cost_estimate=cost,
        )(x, bits, weight, b2)

    return out[:B] if Bp != B else out


if __name__ == "__main__":
    # Small shapes consistent with the module's [B, d] input contract.
    B, INPUT_SIZE, OUTPUT_SIZE = 8, 256, 128

    key = jax.random.PRNGKey(0)
    kx, kw, kb = jax.random.split(key, 3)

    x = jax.random.normal(kx, (B, INPUT_SIZE), dtype=jnp.float32)

    # PyTorch-style Linear init: U(-1/sqrt(fan_in), +1/sqrt(fan_in)).
    bound = 1.0 / (INPUT_SIZE ** 0.5)
    weight = jax.random.uniform(kw, (OUTPUT_SIZE, INPUT_SIZE),
                                dtype=jnp.float32, minval=-bound, maxval=bound)
    bias = jax.random.uniform(kb, (OUTPUT_SIZE,),
                              dtype=jnp.float32, minval=-bound, maxval=bound)

    # Training-mode forward (dropout active, PyTorch default train() semantics).
    # Uses the hardware PRNG on TPU, the portable bits path elsewhere.
    y_train = thumbnail_net(x, weight, bias, seed=1234, training=True)
    y_train = jax.block_until_ready(y_train)
    assert y_train.shape == (B, OUTPUT_SIZE)
    assert bool(jnp.all(jnp.isfinite(y_train)))

    # Also exercise the portable training path explicitly (works on any backend).
    y_train_b = thumbnail_net(x, weight, bias, seed=1234, training=True,
                              use_hw_prng=False)
    y_train_b = jax.block_until_ready(y_train_b)
    assert y_train_b.shape == (B, OUTPUT_SIZE)

    # Eval-mode forward (dropout is identity) — check against pure-JAX reference.
    y_eval = thumbnail_net(x, weight, bias, training=False)
    y_eval = jax.block_until_ready(y_eval)
    y_ref = x @ weight.T + bias
    assert jnp.allclose(y_eval, y_ref, atol=1e-4, rtol=1e-4)

    # Ragged batch (exercises the pad-to-multiple-of-8 path), eval mode.
    y_eval5 = thumbnail_net(x[:5], weight, bias, training=False)
    y_eval5 = jax.block_until_ready(y_eval5)
    assert jnp.allclose(y_eval5, y_ref[:5], atol=1e-4, rtol=1e-4)

    print("KERNEL_OK")
</pallas_src>

<mosaic_0001>
module attributes {stable_mosaic.version = 11 : i64} {
  func.func @_kernel_train_bits(%arg0: i32, %arg1: memref<8x256xf32, #tpu.memory_space<vmem>>, %arg2: memref<8x256xi32, #tpu.memory_space<vmem>>, %arg3: memref<128x256xf32, #tpu.memory_space<vmem>>, %arg4: memref<1x128xf32, #tpu.memory_space<vmem>>, %arg5: memref<8x128xf32, #tpu.memory_space<vmem>>) attributes {dimension_semantics = [#tpu.dimension_semantics<parallel>], iteration_bounds = array<i64: 1>, scalar_prefetch = 0 : i64, scratch_operands = 0 : i64, tpu.core_type = #tpu.core_type<tc>, window_params = [{transform_indices = @transform_0, window_bounds = array<i64: 8, 256>}, {transform_indices = @transform_1, window_bounds = array<i64: 8, 256>}, {pipeline_mode = #tpu.pipeline_mode<synchronous>, transform_indices = @transform_2, window_bounds = array<i64: 128, 256>}, {pipeline_mode = #tpu.pipeline_mode<synchronous>, transform_indices = @transform_3, window_bounds = array<i64: 1, 128>}, {transform_indices = @transform_4, window_bounds = array<i64: 8, 128>}]} {
    %c0 = arith.constant 0 : index
    %c0_0 = arith.constant 0 : index
    %0 = vector.load %arg2[%c0, %c0_0] : memref<8x256xi32, #tpu.memory_space<vmem>>, vector<8x256xi32>
    %c3_i32 = arith.constant 3 : i32
    %1 = vector.broadcast %c3_i32 : i32 to vector<8x256xi32>
    %2 = arith.andi %0, %1 : vector<8x256xi32>
    %c0_i32 = arith.constant 0 : i32
    %3 = vector.broadcast %c0_i32 : i32 to vector<8x256xi32>
    %4 = arith.cmpi ne, %2, %3 : vector<8x256xi32>
    %c0_1 = arith.constant 0 : index
    %c0_2 = arith.constant 0 : index
    %5 = vector.load %arg1[%c0_1, %c0_2] : memref<8x256xf32, #tpu.memory_space<vmem>>, vector<8x256xf32>
    %cst = arith.constant 1.33333337 : f32
    %6 = vector.broadcast %cst : f32 to vector<8x256xf32>
    %7 = arith.mulf %5, %6 : vector<8x256xf32>
    %cst_3 = arith.constant 0.000000e+00 : f32
    %8 = vector.broadcast %cst_3 : f32 to vector<8x256xf32>
    %9 = arith.select %4, %7, %8 : vector<8x256xi1>, vector<8x256xf32>
    %c0_4 = arith.constant 0 : index
    %c0_5 = arith.constant 0 : index
    %10 = vector.load %arg3[%c0_4, %c0_5] : memref<128x256xf32, #tpu.memory_space<vmem>>, vector<128x256xf32>
    %cst_6 = arith.constant dense<0.000000e+00> : vector<8x128xf32>
    %11 = tpu.matmul %9, %10, %cst_6 {dimension_numbers = #tpu.dot_dimension_numbers<[1], [1], [0], [0], [0, 0, 1, 0], [], []>} : vector<8x256xf32>, vector<128x256xf32>, vector<8x128xf32> -> vector<8x128xf32>
    %c0_7 = arith.constant 0 : index
    %c0_8 = arith.constant 0 : index
    %12 = vector.load %arg4[%c0_7, %c0_8] : memref<1x128xf32, #tpu.memory_space<vmem>>, vector<1x128xf32>
    %13 = vector.broadcast %12 : vector<1x128xf32> to vector<8x128xf32>
    %14 = arith.addf %11, %13 : vector<8x128xf32>
    %c0_9 = arith.constant 0 : index
    %c0_10 = arith.constant 0 : index
    %15 = vector.load %arg5[%c0_9, %c0_10] : memref<8x128xf32, #tpu.memory_space<vmem>>, vector<8x128xf32>
    tpu.vector_store %arg5[%c0_9, %c0_10], %14 {strides = array<i32>} : memref<8x128xf32, #tpu.memory_space<vmem>>, vector<8x128xf32>,
    return
  }
  func.func @transform_0(%arg0: i32) -> (i32, i32) {
    %c0_i32 = arith.constant 0 : i32
    %c0_i32_0 = arith.constant 0 : i32
    return %arg0, %c0_i32 : i32, i32
  }
  func.func @transform_1(%arg0: i32) -> (i32, i32) {
    %c0_i32 = arith.constant 0 : i32
    %c0_i32_0 = arith.constant 0 : i32
    return %arg0, %c0_i32 : i32, i32
  }
  func.func @transform_2(%arg0: i32) -> (i32, i32) {
    %c0_i32 = arith.constant 0 : i32
    %c0_i32_0 = arith.constant 0 : i32
    %c0_i32_1 = arith.constant 0 : i32
    return %c0_i32, %c0_i32_0 : i32, i32
  }
  func.func @transform_3(%arg0: i32) -> (i32, i32) {
    %c0_i32 = arith.constant 0 : i32
    %c0_i32_0 = arith.constant 0 : i32
    %c0_i32_1 = arith.constant 0 : i32
    return %c0_i32, %c0_i32_0 : i32, i32
  }
  func.func @transform_4(%arg0: i32) -> (i32, i32) {
    %c0_i32 = arith.constant 0 : i32
    %c0_i32_0 = arith.constant 0 : i32
    return %arg0, %c0_i32 : i32, i32
  }
}

</mosaic_0001>

<bundles_post_ra>
// kernel: tpu_custom_call.1
= control target key start
LH: loop header
LB: loop body
LE: loop exit
PB: predicated region body
PF: predicated region fallthrough
CT: control target
= control target key end

     0   :  { %9 = vsyncpa [#allocation3], 0  ;;  %s410_s0 = inlined_call_operand.hbm [shape: f32[8,256], index: 0, kind: input, shape index: {}]   ;;  %s411_s1 = inlined_call_operand.hbm [shape: u32[8,256], index: 1, kind: input, shape index: {}]   ;;  %s412_s2 = inlined_call_operand.hbm [shape: f32[128,256], index: 2, kind: input, shape index: {}]   ;;  %s413_s3 = inlined_call_operand.vmem [shape: f32[1,128], index: 3, kind: input, shape index: {}]   ;;  %s414_s4 = inlined_call_operand.hbm [shape: f32[8,128], index: 4, kind: output, shape index: {}]  }
   0x1   :  { %10 = vsyncpa [#allocation6], 0 }
   0x2   :  { %11 = vsyncpa [#allocation4], 0  ;;  %s328_s15 = smov [#allocation5]   ;;  %s329_s17 = smov [#allocation2]  }
   0x3   :  { %s28_s16 = sshll.u32 %s328_s15, 4  ;;  %s18_s18 = sshll.u32 %s329_s17, 4  ;;  %s29_s16 = int_to_ptr.vmem [resolvable:$true] %s28_s16  ;;  %s19_s18 = int_to_ptr.vmem [resolvable:$true] %s18_s18 }
   0x4   :  { %s234_s21 = scalar_lea.hbm %s411_s1, 256 }
   0x5   :  { %p235_p0 = scmp.ne.s32.totalorder %s411_s1, %s234_s21  ;;  %p238_p1 = scmp.lt.u32.totalorder %s234_s21, %s411_s1 }
   0x7   :  { %p240_p2 = pnand %p238_p1, %p235_p0 }
   0x9   :  { %243 = shalt.err (!%p240_p2)
}
   0xa   :  { %s244_s26 = scalar_lea.vmem %s29_s16, 256  ;;  %p249_p4 = scmp.lt.s32.totalorder %s29_s16, %s29_s16 }
   0xb   :  { %p245_p3 = scmp.ne.s32.totalorder %s29_s16, %s244_s26  ;;  %p250_p5 = scmp.lt.s32.totalorder %s244_s26, %s244_s26 }
   0xd   :  { %p251_p6 = por %p250_p5, %p249_p4 }
   0xf   :  { %p252_p7 = pnand %p251_p6, %p245_p3 }
  0x11   :  { %255 = shalt.err (!%p252_p7)
}
  0x12   :  { %31 = dma.hbm_to_vmem [thread:$0]  %s411_s1, 256, %s29_s16, [#allocation6]  }
  0x13   :  { %s256_s5 = scalar_lea.hbm %s410_s0, 256 }
  0x14   :  { %p257_p8 = scmp.ne.s32.totalorder %s410_s0, %s256_s5  ;;  %p260_p9 = scmp.lt.u32.totalorder %s256_s5, %s410_s0 }
  0x16   :  { %p262_p10 = pnand %p260_p9, %p257_p8 }
  0x18   :  { %265 = shalt.err (!%p262_p10)
}
  0x19   :  { %s266_s10 = scalar_lea.vmem %s19_s18, 256  ;;  %p271_p12 = scmp.lt.s32.totalorder %s19_s18, %s19_s18 }
  0x1a   :  { %p267_p11 = scmp.ne.s32.totalorder %s19_s18, %s266_s10  ;;  %p272_p13 = scmp.lt.s32.totalorder %s266_s10, %s266_s10 }
  0x1c   :  { %p273_p0 = por %p272_p13, %p271_p12 }
  0x1e   :  { %p274_p1 = pnand %p273_p0, %p267_p11 }
  0x20   :  { %277 = shalt.err (!%p274_p1)
}
  0x21   :  { %21 = dma.hbm_to_vmem [thread:$0]  %s410_s0, 256, %s19_s18, [#allocation3]  }
  0x22   :  { %s330_s12 = smov [#allocation7]   ;;  %s278_s16 = scalar_lea.hbm %s412_s2, 4096 }
  0x23   :  { %s37_s13 = sshll.u32 %s330_s12, 4  ;;  %p279_p2 = scmp.ne.s32.totalorder %s412_s2, %s278_s16  ;;  %s38_s13 = int_to_ptr.vmem [resolvable:$true] %s37_s13 }
  0x24   :  { %p282_p3 = scmp.lt.u32.totalorder %s278_s16, %s412_s2 }
  0x26   :  { %p284_p4 = pnand %p282_p3, %p279_p2 }
  0x28   :  { %287 = shalt.err (!%p284_p4)
}
  0x29   :  { %s288_s22 = scalar_lea.vmem %s38_s13, 4096  ;;  %p293_p6 = scmp.lt.s32.totalorder %s38_s13, %s38_s13 }
  0x2a   :  { %p289_p5 = scmp.ne.s32.totalorder %s38_s13, %s288_s22  ;;  %p294_p7 = scmp.lt.s32.totalorder %s288_s22, %s288_s22 }
  0x2c   :  { %p295_p8 = por %p294_p7, %p293_p6 }
  0x2e   :  { %p296_p9 = pnand %p295_p8, %p289_p5 }
  0x30   :  { %299 = shalt.err (!%p296_p9)
}
  0x31   :  { %s331_s0 = smov 256   ;;  %s332_s18 = smov 16  }
  0x32   :  { %43 = dma.hbm_to_vmem [thread:$0]  %s412_s2, 4096, %s38_s13, [#allocation6], %s331_s0, %s331_s0, %s332_s18  }
  0x33   :  { %322 = dma.done.wait [#allocation3], 256  }
  0x34   :  { %323 = vsyncadd [#allocation3], 4294967040 }
  0x35   :  { %324 = dma.done.wait [#allocation6], 4352  }
  0x36   :  { %325 = vsyncadd [#allocation6], 4294962944  ;;  %v68_v0 = vld [vmem:[#allocation7 + $0x8] sm:$0xff]  ;;  %v70_v1 = vld [vmem:[#allocation7 + $0x18] sm:$0xff]  ;;  %s333_s26 = smov [#allocation8]  }
  0x37   :  { %v67_v2 = vld [vmem:[#allocation7] sm:$0xff]  ;;  %v196_v3 = vpack.c.bf16 %v70_v1, %v68_v0  ;;  %v69_v4 = vld [vmem:[#allocation7 + $0x10] sm:$0xff]  ;;  %v72_v5 = vld [vmem:[#allocation7 + $0x28] sm:$0xff]  ;;  %s183_s27 = sshll.u32 %s333_s26, 4  ;;  %s184_s27 = int_to_ptr.vmem [resolvable:$true] %s183_s27 }
  0x38   :  { %v74_v6 = vld [vmem:[#allocation7 + $0x38] sm:$0xff]  ;;  %v198_v7 = vpack.c.bf16 %v69_v4, %v67_v2  ;;  %v71_v9 = vld [vmem:[#allocation7 + $0x20] sm:$0xff]  ;;  %v73_v10 = vld [vmem:[#allocation7 + $0x30] sm:$0xff]  ;;  %s300_s28 = scalar_lea.vmem %s184_s27, 128  ;;  %p305_p11 = scmp.lt.s32.totalorder %s184_s27, %s184_s27 }
  0x39   :  { %v200_v8 = vpack.c.bf16 %v74_v6, %v72_v5  ;;  %197 = vmatprep.subr.bf16.mxu0 %v196_v3  ;;  %v76_v11 = vld [vmem:[#allocation7 + $0x48] sm:$0xff]  ;;  %v78_v12 = vld [vmem:[#allocation7 + $0x58] sm:$0xff]  ;;  %v202_v13 = vpack.c.bf16 %v73_v10, %v71_v9  ;;  %v75_v19 = vld [vmem:[#allocation7 + $0x40] sm:$0xff]  ;;  %p301_p10 = scmp.ne.s32.totalorder %s184_s27, %s300_s28  ;;  %p306_p12 = scmp.lt.s32.totalorder %s300_s28, %s300_s28 }
  0x3a   :  { %199 = vmatpush1.bf16.xpose.msra.mxu0 %v198_v7  ;;  %v204_v14 = vpack.c.bf16 %v78_v12, %v76_v11  ;;  %v56_v15 = vld [vmem:[#allocation5 + $0x8] sm:$0xff]  ;;  %v62_v17 = vld [vmem:[#allocation2 + $0x8] sm:$0xff]  ;;  %v77_v20 = vld [vmem:[#allocation7 + $0x50] sm:$0xff] }
  0x3b   :  { %201 = vmatprep.subr.bf16.mxu0 %v200_v8  ;;  %v58_v16 = vand.u32 3, %v56_v15  ;;  %v64_v18 = vmul.f32 1.3333334, %v62_v17  ;;  %v80_v21 = vld [vmem:[#allocation7 + $0x68] sm:$0xff]  ;;  %v82_v22 = vld [vmem:[#allocation7 + $0x78] sm:$0xff]  ;;  %v206_v23 = vpack.c.bf16 %v77_v20, %v75_v19  ;;  %v79_v25 = vld [vmem:[#allocation7 + $0x60] sm:$0xff]  ;;  %p307_p13 = por %p306_p12, %p305_p11 }
  0x3c   :  { %v208_v24 = vpack.c.bf16 %v82_v22, %v80_v21  ;;  %v81_v26 = vld [vmem:[#allocation7 + $0x70] sm:$0xff]  ;;  %v84_v27 = vld [vmem:[#allocation7 + $0x88] sm:$0xff]  ;;  %v86_v28 = vld [vmem:[#allocation7 + $0x98] sm:$0xff] }
  0x3d   :  { %vm60_vm0 = vcmp.ne.s32.totalorder %v58_v16, 0  ;;  %v210_v29 = vpack.c.bf16 %v81_v26, %v79_v25  ;;  %v212_v30 = vpack.c.bf16 %v86_v28, %v84_v27  ;;  %v83_v31 = vld [vmem:[#allocation7 + $0x80] sm:$0xff]  ;;  %v85_v32 = vld [vmem:[#allocation7 + $0x90] sm:$0xff]  ;;  %v88_v33 = vld [vmem:[#allocation7 + $0xa8] sm:$0xff]  ;;  %p308_p0 = pnand %p307_p13, %p301_p10 }
  0x3e   :  { %194 = vmatprep.mubr.msk.f32.mxu0 %vm60_vm0, %v64_v18  ;;  %v90_v34 = vld [vmem:[#allocation7 + $0xb8] sm:$0xff]  ;;  %v214_v35 = vpack.c.bf16 %v85_v32, %v83_v31  ;;  %v87_v37 = vld [vmem:[#allocation7 + $0xa0] sm:$0xff]  ;;  %v89_v38 = vld [vmem:[#allocation7 + $0xb0] sm:$0xff] }
  0x3f   :  { %v216_v36 = vpack.c.bf16 %v90_v34, %v88_v33  ;;  %v92_v39 = vld [vmem:[#allocation7 + $0xc8] sm:$0xff]  ;;  %v94_v40 = vld [vmem:[#allocation7 + $0xd8] sm:$0xff]  ;;  %v218_v41 = vpack.c.bf16 %v89_v38, %v87_v37  ;;  %v91_v43 = vld [vmem:[#allocation7 + $0xc0] sm:$0xff] }
  0x40   :  { %v220_v42 = vpack.c.bf16 %v94_v40, %v92_v39  ;;  %v93_v44 = vld [vmem:[#allocation7 + $0xd0] sm:$0xff]  ;;  %v96_v45 = vld [vmem:[#allocation7 + $0xe8] sm:$0xff]  ;;  %v98_v46 = vld [vmem:[#allocation7 + $0xf8] sm:$0xff] }
  0x41   :  { %v222_v47 = vpack.c.bf16 %v93_v44, %v91_v43  ;;  %v224_v48 = vpack.c.bf16 %v98_v46, %v96_v45  ;;  %v95_v49 = vld [vmem:[#allocation7 + $0xe0] sm:$0xff]  ;;  %v97_v50 = vld [vmem:[#allocation7 + $0xf0] sm:$0xff] }
  0x42   :  { %203 = vmatpush1.bf16.xpose.msra.mxu0 %v202_v13  ;;  %v226_v51 = vpack.c.bf16 %v97_v50, %v95_v49  ;;  %v55_v52 = vld [vmem:[#allocation5] sm:$0xff]  ;;  %v61_v54 = vld [vmem:[#allocation2] sm:$0xff] }
  0x43   :  { %205 = vmatprep.subr.bf16.mxu0 %v204_v14  ;;  %v57_v53 = vand.u32 3, %v55_v52  ;;  %v63_v55 = vmul.f32 1.3333334, %v61_v54  ;;  %v193_v56 = vld [vmem:[%s413_s3] ss:$0 sm:$0xff] }
  0x45   :  { %vm59_vm1 = vcmp.ne.s32.totalorder %v57_v53, 0 }
  0x4a   :  { %207 = vmatpush1.bf16.xpose.msra.mxu0 %v206_v23 }
  0x4b   :  { %209 = vmatprep.subr.bf16.mxu0 %v208_v24 }
  0x52   :  { %211 = vmatpush1.bf16.xpose.msra.mxu0 %v210_v29 }
  0x53   :  { %213 = vmatprep.subr.bf16.mxu0 %v212_v30 }
  0x5a   :  { %215 = vmatpush1.bf16.xpose.msra.mxu0 %v214_v35 }
  0x5b   :  { %217 = vmatprep.subr.bf16.mxu0 %v216_v36 }
  0x62   :  { %219 = vmatpush1.bf16.xpose.msra.mxu0 %v218_v41 }
  0x63   :  { %221 = vmatprep.subr.bf16.mxu0 %v220_v42 }
  0x6a   :  { %223 = vmatpush1.bf16.xpose.msra.mxu0 %v222_v47 }
  0x6b   :  { %225 = vmatprep.subr.bf16.mxu0 %v224_v48 }
  0x72   :  { %227 = vmatpush1.bf16.xpose.msra.mxu0 %v226_v51 }
  0x79   :  { %195 = vmatmul.mubr.msk.f32.vlgmr.msra.gmra.mrb[0].mxu0 %vm59_vm1, %v63_v55 }
 0x14c   :  { %v172_v57 = vpop.f32.mrb[0].mxu0 }
 0x14d   :  { %v173_v58 = vadd.f32 %v193_v56, %v172_v57  ;;  %v174_v59 = vpop.f32.mrb[1].mxu0 }
 0x14f   :  { %176 = vst [vmem:[#allocation8] sm:$0xff] %v173_v58 }
 0x150   :  { %311 = shalt.err (!%p308_p0)
}
 0x151   :  { %s312_s5 = scalar_lea.hbm %s414_s4, 128 }
 0x152   :  { %p313_p1 = scmp.ne.s32.totalorder %s414_s4, %s312_s5  ;;  %p316_p2 = scmp.lt.u32.totalorder %s312_s5, %s414_s4 }
 0x154   :  { %p318_p3 = pnand %p316_p2, %p313_p1 }
 0x156   :  { %321 = shalt.err (!%p318_p3)
}
 0x157   :  { %186 = dma.vmem_to_hbm [thread:$0]  %s184_s27, 128, %s414_s4, [#allocation4]  }
 0x158   :  { %326 = dma.done.wait [#allocation4], 128  }
 0x159   :  { %327 = vsyncadd [#allocation4], 4294967168 }
 0x15a   :  { %190 = vsyncpa [#allocation3], 1 }
 0x15b   :  { %191 = vsyncpa [#allocation6], 1 }
 0x15c   :  { %192 = vsyncpa [#allocation4], 1 }

</bundles_post_ra>
